<compile_context>
chip_gen: v5e
topology: v5e:2x2
jax: 0.10.0
libtpu: 0.0.40
codegen_flags: <defaults>
</compile_context>

<pallas_src>
import functools

import jax
import jax.numpy as jnp
from jax.experimental import pallas as pl
from jax.experimental.pallas import tpu as pltpu


def _fused_head_kernel(*refs, num_layers: int, negative_slope: float,
                       mxu_dtype):
    """One M-tile: chain all Linear (+LeakyReLU) layers entirely in VMEM."""
    x_ref = refs[0]
    out_ref = refs[-1]

    h = x_ref[...].astype(jnp.float32)
    for i in range(num_layers):
        w_ref = refs[1 + 2 * i]
        b_ref = refs[2 + 2 * i]
        # MXU matmul in low precision, accumulate in f32.
        y = jnp.dot(h.astype(mxu_dtype), w_ref[...].astype(mxu_dtype),
                    preferred_element_type=jnp.float32)
        # Epilogue (bias + LeakyReLU) stays in f32 on the VPU.
        y = y + b_ref[...].astype(jnp.float32)          # (1, N) broadcast
        if i < num_layers - 1:
            y = jnp.where(y >= 0, y, negative_slope * y)
        h = y
    out_ref[...] = h.astype(out_ref.dtype)


def linear_head_pallas(x, params, *, negative_slope: float = 0.2,
                       mxu_dtype=jnp.bfloat16, block_m: int = 512):
    """Fused LinearHead forward: x (M, K) -> logits (M, N_out).

    params: list of (w, b) with w pre-transposed to (in, out), b of shape (out,).
    """
    M, K = x.shape
    num_layers = len(params)
    assert num_layers >= 1
    assert params[0][0].shape[0] == K
    n_out = params[-1][0].shape[1]

    # --- batch tiling ----------------------------------------------------
    if M <= block_m:
        tm = M                       # single full-array block (legal: == dims)
        pad = 0
        x_in = x
    else:
        tm = block_m                 # multiple of 8 -> satisfies (8,128) rule
        pad = (-M) % tm
        x_in = jnp.pad(x, ((0, pad), (0, 0))) if pad else x
    m_total = M + pad
    grid_m = pl.cdiv(m_total, tm)

    # --- specs ------------------------------------------------------------
    in_specs = [pl.BlockSpec((tm, K), lambda i: (i, 0))]
    flat_params = []
    for (w, b) in params:
        k_i, n_i = w.shape
        assert b.shape == (n_i,)
        flat_params.append(w)
        flat_params.append(b.reshape(1, n_i))
        # Weights/bias: one full block, same index every grid step -> resident.
        in_specs.append(pl.BlockSpec((k_i, n_i), lambda i: (0, 0)))
        in_specs.append(pl.BlockSpec((1, n_i), lambda i: (0, 0)))
    out_spec = pl.BlockSpec((tm, n_out), lambda i: (i, 0))

    # --- cost estimate (advisory) ------------------------------------------
    flops = sum(2 * m_total * w.shape[0] * w.shape[1] for w, _ in params)
    bytes_accessed = (
        x_in.size * x_in.dtype.itemsize
        + sum(w.size * w.dtype.itemsize + b.size * b.dtype.itemsize
              for w, b in params)
        + m_total * n_out * x.dtype.itemsize)

    kernel = functools.partial(_fused_head_kernel, num_layers=num_layers,
                               negative_slope=negative_slope,
                               mxu_dtype=mxu_dtype)

    out = pl.pallas_call(
        kernel,
        out_shape=jax.ShapeDtypeStruct((m_total, n_out), x.dtype),
        grid=(grid_m,),
        in_specs=in_specs,
        out_specs=out_spec,
        compiler_params=pltpu.CompilerParams(
            # M tiles are independent -> shard across TCs on v7x.
            dimension_semantics=("parallel",),
            # Sized well under v7x's 64 MiB physical VMEM; plenty everywhere.
            vmem_limit_bytes=32 * 1024 * 1024),
        cost_estimate=pl.CostEstimate(flops=flops, transcendentals=0,
                                      bytes_accessed=bytes_accessed),
    )(x_in, *flat_params)

    return out[:M] if pad else out


def init_linear_head_params(key, in_channels, out_channels,
                            latent_channels=()):
    """Deterministic parameter init (PyTorch-Linear-like uniform ranges).

    Weights stored pre-transposed as (in, out) so kernel output is lane-dense.
    """
    channels = [in_channels, *latent_channels, out_channels]
    params = []
    for idx, (c_in, c_out) in enumerate(zip(channels[:-1], channels[1:])):
        kw, kb = jax.random.split(jax.random.fold_in(key, idx))
        bound = 1.0 / (c_in ** 0.5)
        w = jax.random.uniform(kw, (c_in, c_out), jnp.float32, -bound, bound)
        b = jax.random.uniform(kb, (c_out,), jnp.float32, -bound, bound)
        params.append((w, b))
    return params


def _reference_forward(x, params, negative_slope: float = 0.2,
                       mxu_dtype=jnp.float32):
    """Pure-JAX reference mirroring the kernel's MXU precision choice."""
    n = len(params)
    h = x.astype(jnp.float32)
    for i, (w, b) in enumerate(params):
        y = jnp.dot(h.astype(mxu_dtype), w.astype(mxu_dtype),
                    preferred_element_type=jnp.float32)
        y = y + b.astype(jnp.float32)
        if i != n - 1:
            y = jnp.where(y >= 0, y, negative_slope * y)
        h = y
    return h.astype(x.dtype)


if __name__ == "__main__":
    key = jax.random.PRNGKey(0)

    batch = 8
    in_channels = 32
    latent_channels = (64,)
    out_channels = 16

    kx, kp = jax.random.split(key)
    x = jax.random.normal(kx, (batch, in_channels), jnp.float32)
    params = init_linear_head_params(kp, in_channels, out_channels,
                                     latent_channels)

    # 1) Full-precision MXU path: must match the f32 reference tightly.
    out_f32 = jax.block_until_ready(
        linear_head_pallas(x, params, mxu_dtype=jnp.float32))
    ref_f32 = _reference_forward(x, params, mxu_dtype=jnp.float32)
    assert out_f32.shape == (batch, out_channels)
    assert jnp.allclose(out_f32, ref_f32, atol=1e-5, rtol=1e-5)

    # 2) Recommended bf16-MXU path (f32 accumulate / epilogue): compare against
    #    a reference that makes the same precision choice.
    out_bf16 = jax.block_until_ready(linear_head_pallas(x, params))
    ref_bf16 = _reference_forward(x, params, mxu_dtype=jnp.bfloat16)
    assert jnp.allclose(out_bf16, ref_bf16, atol=1e-3, rtol=1e-3)

    # 3) Exercise the tiled + padded batch path (grid over M, parallel axis).
    kx2 = jax.random.fold_in(kx, 1)
    x_big = jax.random.normal(kx2, (1000, in_channels), jnp.float32)
    out_big = jax.block_until_ready(
        linear_head_pallas(x_big, params, mxu_dtype=jnp.float32, block_m=256))
    ref_big = _reference_forward(x_big, params, mxu_dtype=jnp.float32)
    assert out_big.shape == (1000, out_channels)
    assert jnp.allclose(out_big, ref_big, atol=1e-5, rtol=1e-5)

    print("KERNEL_OK")
</pallas_src>

<mosaic_0001>
module attributes {stable_mosaic.version = 11 : i64} {
  func.func @_fused_head_kernel(%arg0: i32, %arg1: memref<8x32xf32, #tpu.memory_space<vmem>>, %arg2: memref<32x64xf32, #tpu.memory_space<vmem>>, %arg3: memref<1x64xf32, #tpu.memory_space<vmem>>, %arg4: memref<64x16xf32, #tpu.memory_space<vmem>>, %arg5: memref<1x16xf32, #tpu.memory_space<vmem>>, %arg6: memref<8x16xf32, #tpu.memory_space<vmem>>) attributes {dimension_semantics = [#tpu.dimension_semantics<parallel>], iteration_bounds = array<i64: 1>, scalar_prefetch = 0 : i64, scratch_operands = 0 : i64, tpu.core_type = #tpu.core_type<tc>, window_params = [{transform_indices = @transform_0, window_bounds = array<i64: 8, 32>}, {pipeline_mode = #tpu.pipeline_mode<synchronous>, transform_indices = @transform_1, window_bounds = array<i64: 32, 64>}, {pipeline_mode = #tpu.pipeline_mode<synchronous>, transform_indices = @transform_2, window_bounds = array<i64: 1, 64>}, {pipeline_mode = #tpu.pipeline_mode<synchronous>, transform_indices = @transform_3, window_bounds = array<i64: 64, 16>}, {pipeline_mode = #tpu.pipeline_mode<synchronous>, transform_indices = @transform_4, window_bounds = array<i64: 1, 16>}, {transform_indices = @transform_5, window_bounds = array<i64: 8, 16>}]} {
    %c0 = arith.constant 0 : index
    %c0_0 = arith.constant 0 : index
    %0 = vector.load %arg1[%c0, %c0_0] : memref<8x32xf32, #tpu.memory_space<vmem>>, vector<8x32xf32>
    %c0_1 = arith.constant 0 : index
    %c0_2 = arith.constant 0 : index
    %1 = vector.load %arg2[%c0_1, %c0_2] : memref<32x64xf32, #tpu.memory_space<vmem>>, vector<32x64xf32>
    %cst = arith.constant dense<0.000000e+00> : vector<8x64xf32>
    %2 = tpu.matmul %0, %1, %cst {dimension_numbers = #tpu.dot_dimension_numbers<[1], [0], [0], [1], [0, 0, 1, 1], [], []>} : vector<8x32xf32>, vector<32x64xf32>, vector<8x64xf32> -> vector<8x64xf32>
    %c0_3 = arith.constant 0 : index
    %c0_4 = arith.constant 0 : index
    %3 = vector.load %arg3[%c0_3, %c0_4] : memref<1x64xf32, #tpu.memory_space<vmem>>, vector<1x64xf32>
    %4 = vector.broadcast %3 : vector<1x64xf32> to vector<8x64xf32>
    %5 = arith.addf %2, %4 : vector<8x64xf32>
    %cst_5 = arith.constant 0.000000e+00 : f32
    %6 = vector.broadcast %cst_5 : f32 to vector<8x64xf32>
    %7 = arith.cmpf oge, %5, %6 : vector<8x64xf32>
    %cst_6 = arith.constant 2.000000e-01 : f32
    %8 = vector.broadcast %cst_6 : f32 to vector<8x64xf32>
    %9 = arith.mulf %8, %5 : vector<8x64xf32>
    %10 = arith.select %7, %5, %9 : vector<8x64xi1>, vector<8x64xf32>
    %c0_7 = arith.constant 0 : index
    %c0_8 = arith.constant 0 : index
    %11 = vector.load %arg4[%c0_7, %c0_8] : memref<64x16xf32, #tpu.memory_space<vmem>>, vector<64x16xf32>
    %cst_9 = arith.constant dense<0.000000e+00> : vector<8x16xf32>
    %12 = tpu.matmul %10, %11, %cst_9 {dimension_numbers = #tpu.dot_dimension_numbers<[1], [0], [0], [1], [0, 0, 1, 1], [], []>} : vector<8x64xf32>, vector<64x16xf32>, vector<8x16xf32> -> vector<8x16xf32>
    %c0_10 = arith.constant 0 : index
    %c0_11 = arith.constant 0 : index
    %13 = vector.load %arg5[%c0_10, %c0_11] : memref<1x16xf32, #tpu.memory_space<vmem>>, vector<1x16xf32>
    %14 = vector.broadcast %13 : vector<1x16xf32> to vector<8x16xf32>
    %15 = arith.addf %12, %14 : vector<8x16xf32>
    %c0_12 = arith.constant 0 : index
    %c0_13 = arith.constant 0 : index
    %16 = vector.load %arg6[%c0_12, %c0_13] : memref<8x16xf32, #tpu.memory_space<vmem>>, vector<8x16xf32>
    tpu.vector_store %arg6[%c0_12, %c0_13], %15 {strides = array<i32>} : memref<8x16xf32, #tpu.memory_space<vmem>>, vector<8x16xf32>,
    return
  }
  func.func @transform_0(%arg0: i32) -> (i32, i32) {
    %c0_i32 = arith.constant 0 : i32
    %c0_i32_0 = arith.constant 0 : i32
    return %arg0, %c0_i32 : i32, i32
  }
  func.func @transform_1(%arg0: i32) -> (i32, i32) {
    %c0_i32 = arith.constant 0 : i32
    %c0_i32_0 = arith.constant 0 : i32
    %c0_i32_1 = arith.constant 0 : i32
    return %c0_i32, %c0_i32_0 : i32, i32
  }
  func.func @transform_2(%arg0: i32) -> (i32, i32) {
    %c0_i32 = arith.constant 0 : i32
    %c0_i32_0 = arith.constant 0 : i32
    %c0_i32_1 = arith.constant 0 : i32
    return %c0_i32, %c0_i32_0 : i32, i32
  }
  func.func @transform_3(%arg0: i32) -> (i32, i32) {
    %c0_i32 = arith.constant 0 : i32
    %c0_i32_0 = arith.constant 0 : i32
    %c0_i32_1 = arith.constant 0 : i32
    return %c0_i32, %c0_i32_0 : i32, i32
  }
  func.func @transform_4(%arg0: i32) -> (i32, i32) {
    %c0_i32 = arith.constant 0 : i32
    %c0_i32_0 = arith.constant 0 : i32
    %c0_i32_1 = arith.constant 0 : i32
    return %c0_i32, %c0_i32_0 : i32, i32
  }
  func.func @transform_5(%arg0: i32) -> (i32, i32) {
    %c0_i32 = arith.constant 0 : i32
    %c0_i32_0 = arith.constant 0 : i32
    return %arg0, %c0_i32 : i32, i32
  }
}

</mosaic_0001>

<bundles_post_ra>
// kernel: tpu_custom_call.1
= control target key start
LH: loop header
LB: loop body
LE: loop exit
PB: predicated region body
PF: predicated region fallthrough
CT: control target
= control target key end

     0   :  { %s221_s0 = inlined_call_operand.vmem [shape: f32[8,32], index: 0, kind: input, shape index: {}]   ;;  %s222_s1 = inlined_call_operand.vmem [shape: f32[32,64], index: 1, kind: input, shape index: {}]   ;;  %s223_s2 = inlined_call_operand.vmem [shape: f32[1,64], index: 2, kind: input, shape index: {}]   ;;  %s224_s3 = inlined_call_operand.vmem [shape: f32[64,16], index: 3, kind: input, shape index: {}]   ;;  %s225_s4 = inlined_call_operand.vmem [shape: f32[1,16], index: 4, kind: input, shape index: {}]   ;;  %s226_s5 = inlined_call_operand.hbm [shape: f32[8,16], index: 5, kind: output, shape index: {}]  }
   0x1   :  { %v25_v0 = vld [vmem:[%s222_s1 + $0x18] sm:$0xff]  ;;  %v24_v1 = vld [vmem:[%s222_s1 + $0x10] sm:$0xff]  ;;  %v23_v3 = vld [vmem:[%s222_s1 + $0x8] sm:$0xff] }
   0x2   :  { %46 = vmatpush.msra.mxu0 %v25_v0  ;;  %v64_v2 = vld [vmem:[%s224_s3 + $0x38] sm:$0xff]  ;;  %v63_v4 = vld [vmem:[%s224_s3 + $0x30] sm:$0xff]  ;;  %v62_v5 = vld [vmem:[%s224_s3 + $0x28] sm:$0xff] }
   0x3   :  { %81 = vmatpush.msra.mxu1 %v64_v2  ;;  %v22_v6 = vld [vmem:[%s222_s1] sm:$0xff] }
   0x4   :  { %47 = vmatpush.msra.mxu0 %v24_v1 }
   0x5   :  { %82 = vmatpush.msra.mxu1 %v63_v4 }
   0x6   :  { %10 = vsyncpa [#allocation3], 0  ;;  %48 = vmatpush.msra.mxu0 %v23_v3  ;;  %v21_v7 = vld [vmem:[%s221_s0] sm:$0xff]  ;;  %vm30_vm0 = vcmask 261120   ;;  %v60_v9 = vld [vmem:[%s224_s3 + $0x18] sm:$0xff]  ;;  %vm69_vm2 = vcmask 523264  }
   0x7   :  { %v61_v8 = vld [vmem:[%s224_s3 + $0x20] sm:$0xff]  ;;  %83 = vmatpush.msra.mxu1 %v62_v5  ;;  %v59_v10 = vld [vmem:[%s224_s3 + $0x10] sm:$0xff]  ;;  %v58_v11 = vld [vmem:[%s224_s3 + $0x8] sm:$0xff]  ;;  %s142_s21 = smov [#allocation2]   ;;  %s102_s24 = sshll.u32 %s226_s5, 4  ;;  %vm93_vm3 = vcmask 130048   ;;  %s103_s24 = int_to_ptr.hbm [resolvable:$true] %s102_s24 }
   0x8   :  { %49 = vmatpush.msra.mxu0 %v22_v6  ;;  %v57_v12 = vld [vmem:[%s224_s3] sm:$0xff]  ;;  %s100_s22 = sshll.u32 %s142_s21, 4  ;;  %s101_s22 = int_to_ptr.vmem [resolvable:$true] %s100_s22 }
   0x9   :  { %111 = vmatmul.msk.f32.vlgmr.msra.gmra.mxu0 %vm30_vm0, %v21_v7  ;;  %84 = vmatpush.msra.mxu1 %v61_v8  ;;  %v114_v13 = vld [vmem:[%s223_s2] ss:$0 sm:$0xff] }
   0xa   :  { %v115_v18 = vld [vmem:[%s225_s4] ss:$0 sm:$0xff] }
   0xb   :  { %85 = vmatpush.msra.mxu1 %v60_v9 }
   0xd   :  { %86 = vmatpush.msra.mxu1 %v59_v10 }
   0xf   :  { %87 = vmatpush.msra.mxu1 %v58_v11 }
  0x11   :  { %88 = vmatpush.msra.mxu1 %v57_v12 }
  0x86   :  { %v51_v14 = vpop.f32.mrf.mxu0 }
  0x87   :  { %v52_v15 = vadd.f32 %v114_v13, %v51_v14 }
  0x89   :  { %v55_v16 = vmul.f32 0.2, %v52_v15  ;;  %vm54_vm1 = vcmp.ge.f32.partialorder %v52_v15, 0.0 }
  0x8b   :  { %v56_v17 = vsel %vm54_vm1, %v52_v15, %v55_v16 }
  0x8c   :  { %112 = vmatmul.msk.f32.vlgmr.msra.gmra.mxu1 %vm69_vm2, %v56_v17 }
 0x109   :  { %v90_v19 = vpop.f32.mrf.mxu1 }
 0x10a   :  { %v91_v20 = vadd.f32 %v115_v18, %v90_v19 }
 0x10c   :  { %94 = vst.msk [vmem:[#allocation2] sm:$0xff] %vm93_vm3, %v91_v20 }
 0x10d   :  { %105 = dma.vmem_to_hbm [thread:$0]  %s101_s22, 128, %s103_s24, [#allocation3]  }
 0x10e   :  { %140 = dma.done.wait [#allocation3], 128  }
 0x10f   :  { %141 = vsyncadd [#allocation3], 4294967168 }
 0x110   :  { %110 = vsyncpa [#allocation3], 1 }

</bundles_post_ra>
